<compile_context>
chip_gen: v7x
topology: tpu7x:2x2x1
jax: 0.10.0
libtpu: 0.0.40
codegen_flags: <defaults>
</compile_context>

<pallas_src>
import functools

import jax
import jax.numpy as jnp
from jax.experimental import pallas as pl
from jax.experimental.pallas import tpu as pltpu


def _round_up(a, b):
    return -(-a // b) * b


def _extract_topk(cur, k, fill_lo):
    """Top-k values per row of `cur` (no NaNs), descending. cur: (TR, n)."""
    if k == 1:
        return jnp.max(cur, axis=-1, keepdims=True)
    tr, n = cur.shape
    col = jax.lax.broadcasted_iota(jnp.int32, (tr, n), 1)
    outs = []
    for step in range(k):
        m = jnp.max(cur, axis=-1, keepdims=True)              # (TR, 1)
        outs.append(m)
        if step + 1 < k:
            # Mask only the FIRST occurrence of the max (torch duplicate
            # multiplicity), then continue.
            ids = jnp.where(cur == m, col, n)
            first = jnp.min(ids, axis=-1, keepdims=True)
            cur = jnp.where(col == first, fill_lo, cur)
    return jnp.concatenate(outs, axis=-1)                      # (TR, k)


def _kmax_kernel(x_ref, o_ref, acc_ref, cnt_ref, *, k, L, tl, fill_lo,
                 fill_hi, is_float, mask_tail):
    j = pl.program_id(1)
    nl = pl.num_programs(1)

    x = x_ref[...]                                             # (TR, TL)
    if mask_tail:
        # Lanes past L (ragged last chunk / OOB garbage) never win.
        lane = jax.lax.broadcasted_iota(jnp.int32, x.shape, 1)
        x = jnp.where(j * tl + lane < L, x, fill_lo)
    if is_float:
        # Count NaNs once and map them to the "largest" value; the k-loop
        # below then needs no per-iteration NaN handling.
        nan_mask = jnp.isnan(x)
        nan_cnt = jnp.sum(nan_mask, axis=-1, keepdims=True, dtype=jnp.int32)
        x = jnp.where(nan_mask, fill_hi, x)

    local = _extract_topk(x, k, fill_lo)                       # (TR, k)

    @pl.when(j == 0)
    def _():
        acc_ref[...] = local
        if is_float:
            cnt_ref[...] = nan_cnt

    @pl.when(j > 0)
    def _():
        # Merge running top-k with this chunk's top-k via a tiny extraction.
        cand = jnp.concatenate([acc_ref[...], local], axis=-1)  # (TR, 2k)
        acc_ref[...] = _extract_topk(cand, k, fill_lo)
        if is_float:
            cnt_ref[...] = cnt_ref[...] + nan_cnt

    @pl.when(j == nl - 1)
    def _():
        res = acc_ref[...]
        if is_float:
            # The first min(nan_count, k) outputs are NaN (torch ordering).
            pos = jax.lax.broadcasted_iota(jnp.int32, res.shape, 1)
            res = jnp.where(pos < cnt_ref[...], jnp.nan, res)
        o_ref[...] = res


def _select_tiles(rows, L, itemsize, k):
    """Pick (TR, TL): sublane/lane aligned, sized by a per-block budget."""
    sub = max(8, 32 // itemsize)            # 8 f32 / 16 bf16 / 32 int8 rows
    lane = 128
    # Element budget per input block: k==1 is purely HBM-bound -> bigger
    # blocks; k>=2 carries int32 per-element temporaries -> moderate blocks.
    budget_elems = (2 * 1024 * 1024) if k == 1 else (1024 * 1024)
    L_eff = _round_up(L, lane)
    rows_eff = _round_up(rows, sub)

    # Keep >= 2 row tiles when the row count allows it (megacore "parallel").
    tr_cap = rows_eff
    if rows_eff >= 2 * sub:
        tr_cap = _round_up((rows_eff + 1) // 2, sub)

    if sub * L_eff <= budget_elems:
        tl = L                              # whole row in one block
        tr = max(sub, min((budget_elems // L_eff) // sub * sub, tr_cap))
    else:
        tr = max(sub, min(128, tr_cap))     # squarer chunked blocks
        tl = max(512, (budget_elems // tr) // lane * lane)
    return tr, tl


def kmax_pool(x, k=1, *, tile_rows=None, tile_l=None):
    """x: (N, C, L) -> (N, C*k), matching KMaxPool.forward."""
    N, C, L = x.shape
    if not 1 <= k <= L:
        raise ValueError(f"k={k} must satisfy 1 <= k <= L={L}")
    rows = N * C
    dtype = x.dtype
    itemsize = jnp.dtype(dtype).itemsize
    is_float = bool(jnp.issubdtype(dtype, jnp.floating))
    if is_float:
        name = jnp.dtype(dtype).name
        has_inf = not (name.startswith("float8") and "fn" in name)
        fill_lo = float("-inf") if has_inf else float(jnp.finfo(dtype).min)
        fill_hi = float("inf") if has_inf else float(jnp.finfo(dtype).max)
    else:
        fill_lo = int(jnp.iinfo(dtype).min)
        fill_hi = 0                          # unused for integers

    x2 = x.reshape(rows, L)

    TR, TL = _select_tiles(rows, L, itemsize, k)
    if tile_rows is not None:
        TR = tile_rows
    if tile_l is not None:
        TL = tile_l

    nr = -(-rows // TR)
    nl = -(-L // TL)
    mask_tail = (nl * TL) != L

    # VMEM budget: double-buffered input block + output block + scratch + an
    # allowance for int32 per-element temporaries of the extraction loop.
    lane = 128
    in_blk = TR * _round_up(TL, lane) * itemsize
    out_blk = TR * _round_up(k, lane) * itemsize
    scratch = TR * _round_up(k, lane) * itemsize + TR * lane * 4
    temps = (2 if k == 1 else 5) * TR * _round_up(TL, lane) * 4
    need = 2 * in_blk + 2 * out_blk + scratch + temps + (4 << 20)
    try:
        cap = int(pltpu.get_tpu_info().vmem_capacity_bytes)
    except Exception:
        cap = 64 << 20                       # conservative (v7x per-core VMEM)
    vmem_limit = int(min(max(need, 48 << 20), max(cap - (12 << 20), 32 << 20)))

    out = pl.pallas_call(
        functools.partial(_kmax_kernel, k=k, L=L, tl=TL, fill_lo=fill_lo,
                          fill_hi=fill_hi, is_float=is_float,
                          mask_tail=mask_tail),
        out_shape=jax.ShapeDtypeStruct((rows, k), dtype),
        grid=(nr, nl),
        in_specs=[pl.BlockSpec((TR, TL), lambda i, j: (i, j))],
        out_specs=pl.BlockSpec((TR, k), lambda i, j: (i, 0)),
        scratch_shapes=[pltpu.VMEM((TR, k), dtype),
                        pltpu.VMEM((TR, 1), jnp.int32)],
        compiler_params=pltpu.CompilerParams(
            dimension_semantics=("parallel", "arbitrary"),
            vmem_limit_bytes=vmem_limit),
        cost_estimate=pl.CostEstimate(
            flops=(3 + 4 * max(k - 1, 0)) * rows * L,
            transcendentals=0,
            bytes_accessed=(rows * L + rows * k) * itemsize),
    )(x2)

    return out.reshape(N, C * k)


if __name__ == "__main__":
    key = jax.random.PRNGKey(0)
    k1, k2, k3, k4 = jax.random.split(key, 4)

    # 1) Whole-row path (aligned rows), k=2.
    x1 = jax.random.normal(k1, (2, 4, 16), dtype=jnp.float32)
    o1 = jax.block_until_ready(kmax_pool(x1, k=2))
    r1 = jax.lax.top_k(x1, 2)[0].reshape(2, 8)
    assert o1.shape == (2, 8), o1.shape
    assert jnp.allclose(o1, r1), (o1, r1)

    # 2) Chunked-L path with a ragged tail (L=300, TL=128), k=3.
    x2 = jax.random.normal(k2, (2, 4, 300), dtype=jnp.float32)
    o2 = jax.block_until_ready(kmax_pool(x2, k=3, tile_l=128))
    r2 = jax.lax.top_k(x2, 3)[0].reshape(2, 12)
    assert jnp.allclose(o2, r2), (o2, r2)

    # 3) k=1 fast path, bf16, ragged row count (rows=15, not a tile multiple).
    x3 = jax.random.normal(k3, (3, 5, 64), dtype=jnp.bfloat16)
    o3 = jax.block_until_ready(kmax_pool(x3, k=1))
    r3 = jax.lax.top_k(x3, 1)[0].reshape(3, 5)
    assert jnp.array_equal(o3, r3), (o3, r3)

    # 4) NaN handling across L chunks (torch.topk treats NaN as largest).
    x4 = jax.random.normal(k4, (1, 8, 300), dtype=jnp.float32)
    x4 = x4.at[0, 3, 200].set(jnp.nan)
    x4 = x4.at[0, 6, 10].set(jnp.nan)
    x4 = x4.at[0, 6, 150].set(jnp.nan)
    x4 = x4.at[0, 6, 290].set(jnp.nan)
    o4 = jax.block_until_ready(kmax_pool(x4, k=2, tile_l=128)).reshape(8, 2)
    r4 = jax.lax.top_k(x4, 2)[0].reshape(8, 2)
    for r in (0, 1, 2, 4, 5, 7):
        assert jnp.allclose(o4[r], r4[r]), (r, o4[r], r4[r])
    row3 = x4[0, 3]
    best3 = jnp.max(jnp.where(jnp.isnan(row3), -jnp.inf, row3))
    assert jnp.isnan(o4[3, 0]) and jnp.allclose(o4[3, 1], best3), o4[3]
    assert jnp.isnan(o4[6, 0]) and jnp.isnan(o4[6, 1]), o4[6]

    print("KERNEL_OK")
</pallas_src>

<mosaic_0001>
module attributes {stable_mosaic.version = 11 : i64} {
  func.func @_kmax_kernel(%arg0: i32, %arg1: i32, %arg2: memref<8x16xf32, #tpu.memory_space<vmem>>, %arg3: memref<8x2xf32, #tpu.memory_space<vmem>>, %arg4: memref<8x2xf32, #tpu.memory_space<vmem>>, %arg5: memref<8x1xi32, #tpu.memory_space<vmem>>) attributes {dimension_semantics = [#tpu.dimension_semantics<parallel>, #tpu.dimension_semantics<arbitrary>], iteration_bounds = array<i64: 1, 1>, scalar_prefetch = 0 : i64, scratch_operands = 2 : i64, tpu.core_type = #tpu.core_type<tc>, window_params = [{transform_indices = @transform_0, window_bounds = array<i64: 8, 16>}, {transform_indices = @transform_1, window_bounds = array<i64: 8, 2>}]} {
    %c0 = arith.constant 0 : index
    %c0_0 = arith.constant 0 : index
    %0 = vector.load %arg2[%c0, %c0_0] : memref<8x16xf32, #tpu.memory_space<vmem>>, vector<8x16xf32>
    %1 = arith.cmpf one, %0, %0 : vector<8x16xf32>
    %2 = arith.extui %1 : vector<8x16xi1> to vector<8x16xi32>
    %cst = arith.constant dense<0> : vector<8xi32>
    %3 = vector.multi_reduction <add>, %2, %cst [1] : vector<8x16xi32> to vector<8xi32>
    %4 = vector.shape_cast %3 : vector<8xi32> to vector<8x1xi32>
    %cst_1 = arith.constant 0x7F800000 : f32
    %5 = vector.broadcast %cst_1 : f32 to vector<8x16xf32>
    %6 = arith.select %1, %5, %0 : vector<8x16xi1>, vector<8x16xf32>
    %7 = tpu.iota {dimensions = array<i32: 1>} : vector<8x16xi32>
    %cst_2 = arith.constant dense<0xFF800000> : vector<8xf32>
    %8 = vector.multi_reduction <maximumf>, %6, %cst_2 [1] : vector<8x16xf32> to vector<8xf32>
    %9 = vector.shape_cast %8 : vector<8xf32> to vector<8x1xf32>
    %10 = vector.broadcast %9 : vector<8x1xf32> to vector<8x16xf32>
    %11 = arith.cmpf oeq, %6, %10 : vector<8x16xf32>
    %c16_i32 = arith.constant 16 : i32
    %12 = vector.broadcast %c16_i32 : i32 to vector<8x16xi32>
    %13 = arith.select %11, %7, %12 : vector<8x16xi1>, vector<8x16xi32>
    %cst_3 = arith.constant dense<2147483647> : vector<8xi32>
    %14 = vector.multi_reduction <minsi>, %13, %cst_3 [1] : vector<8x16xi32> to vector<8xi32>
    %15 = vector.shape_cast %14 : vector<8xi32> to vector<8x1xi32>
    %16 = vector.broadcast %15 : vector<8x1xi32> to vector<8x16xi32>
    %17 = arith.cmpi eq, %7, %16 : vector<8x16xi32>
    %cst_4 = arith.constant 0xFF800000 : f32
    %18 = vector.broadcast %cst_4 : f32 to vector<8x16xf32>
    %19 = arith.select %17, %18, %6 : vector<8x16xi1>, vector<8x16xf32>
    %cst_5 = arith.constant dense<0xFF800000> : vector<8xf32>
    %20 = vector.multi_reduction <maximumf>, %19, %cst_5 [1] : vector<8x16xf32> to vector<8xf32>
    %21 = vector.shape_cast %20 : vector<8xf32> to vector<8x1xf32>
    %22 = tpu.concatenate %9, %21 in 1 : vector<8x1xf32>, vector<8x1xf32> -> vector<8x2xf32>
    %c0_i32 = arith.constant 0 : i32
    %23 = arith.cmpi eq, %arg1, %c0_i32 : i32
    %24 = arith.extui %23 : i1 to i32
    %c0_i32_6 = arith.constant 0 : i32
    %25 = arith.cmpi ne, %24, %c0_i32_6 : i32
    scf.if %25 {
      %c0_11 = arith.constant 0 : index
      %c0_12 = arith.constant 0 : index
      %32 = vector.load %arg4[%c0_11, %c0_12] : memref<8x2xf32, #tpu.memory_space<vmem>>, vector<8x2xf32>
      tpu.vector_store %arg4[%c0_11, %c0_12], %22 {strides = array<i32>} : memref<8x2xf32, #tpu.memory_space<vmem>>, vector<8x2xf32>,
      %c0_13 = arith.constant 0 : index
      %c0_14 = arith.constant 0 : index
      %33 = vector.load %arg5[%c0_13, %c0_14] : memref<8x1xi32, #tpu.memory_space<vmem>>, vector<8x1xi32>
      tpu.vector_store %arg5[%c0_13, %c0_14], %4 {strides = array<i32>} : memref<8x1xi32, #tpu.memory_space<vmem>>, vector<8x1xi32>,
    } else {
    }
    %c0_i32_7 = arith.constant 0 : i32
    %26 = arith.cmpi sgt, %arg1, %c0_i32_7 : i32
    %27 = arith.extui %26 : i1 to i32
    %c0_i32_8 = arith.constant 0 : i32
    %28 = arith.cmpi ne, %27, %c0_i32_8 : i32
    scf.if %28 {
      %c0_11 = arith.constant 0 : index
      %c0_12 = arith.constant 0 : index
      %32 = vector.load %arg4[%c0_11, %c0_12] : memref<8x2xf32, #tpu.memory_space<vmem>>, vector<8x2xf32>
      %33 = tpu.concatenate %32, %22 in 1 : vector<8x2xf32>, vector<8x2xf32> -> vector<8x4xf32>
      %34 = tpu.iota {dimensions = array<i32: 1>} : vector<8x4xi32>
      %cst_13 = arith.constant dense<0xFF800000> : vector<8xf32>
      %35 = vector.multi_reduction <maximumf>, %33, %cst_13 [1] : vector<8x4xf32> to vector<8xf32>
      %36 = vector.shape_cast %35 : vector<8xf32> to vector<8x1xf32>
      %37 = vector.broadcast %36 : vector<8x1xf32> to vector<8x4xf32>
      %38 = arith.cmpf oeq, %33, %37 : vector<8x4xf32>
      %c4_i32 = arith.constant 4 : i32
      %39 = vector.broadcast %c4_i32 : i32 to vector<8x4xi32>
      %40 = arith.select %38, %34, %39 : vector<8x4xi1>, vector<8x4xi32>
      %cst_14 = arith.constant dense<2147483647> : vector<8xi32>
      %41 = vector.multi_reduction <minsi>, %40, %cst_14 [1] : vector<8x4xi32> to vector<8xi32>
      %42 = vector.shape_cast %41 : vector<8xi32> to vector<8x1xi32>
      %43 = vector.broadcast %42 : vector<8x1xi32> to vector<8x4xi32>
      %44 = arith.cmpi eq, %34, %43 : vector<8x4xi32>
      %cst_15 = arith.constant 0xFF800000 : f32
      %45 = vector.broadcast %cst_15 : f32 to vector<8x4xf32>
      %46 = arith.select %44, %45, %33 : vector<8x4xi1>, vector<8x4xf32>
      %cst_16 = arith.constant dense<0xFF800000> : vector<8xf32>
      %47 = vector.multi_reduction <maximumf>, %46, %cst_16 [1] : vector<8x4xf32> to vector<8xf32>
      %48 = vector.shape_cast %47 : vector<8xf32> to vector<8x1xf32>
      %49 = tpu.concatenate %36, %48 in 1 : vector<8x1xf32>, vector<8x1xf32> -> vector<8x2xf32>
      %c0_17 = arith.constant 0 : index
      %c0_18 = arith.constant 0 : index
      %50 = vector.load %arg4[%c0_17, %c0_18] : memref<8x2xf32, #tpu.memory_space<vmem>>, vector<8x2xf32>
      tpu.vector_store %arg4[%c0_17, %c0_18], %49 {strides = array<i32>} : memref<8x2xf32, #tpu.memory_space<vmem>>, vector<8x2xf32>,
      %c0_19 = arith.constant 0 : index
      %c0_20 = arith.constant 0 : index
      %51 = vector.load %arg5[%c0_19, %c0_20] : memref<8x1xi32, #tpu.memory_space<vmem>>, vector<8x1xi32>
      %52 = arith.addi %51, %4 : vector<8x1xi32>
      %c0_21 = arith.constant 0 : index
      %c0_22 = arith.constant 0 : index
      %53 = vector.load %arg5[%c0_21, %c0_22] : memref<8x1xi32, #tpu.memory_space<vmem>>, vector<8x1xi32>
      tpu.vector_store %arg5[%c0_21, %c0_22], %52 {strides = array<i32>} : memref<8x1xi32, #tpu.memory_space<vmem>>, vector<8x1xi32>,
    } else {
    }
    %c0_i32_9 = arith.constant 0 : i32
    %29 = arith.cmpi eq, %arg1, %c0_i32_9 : i32
    %30 = arith.extui %29 : i1 to i32
    %c0_i32_10 = arith.constant 0 : i32
    %31 = arith.cmpi ne, %30, %c0_i32_10 : i32
    scf.if %31 {
      %c0_11 = arith.constant 0 : index
      %c0_12 = arith.constant 0 : index
      %32 = vector.load %arg4[%c0_11, %c0_12] : memref<8x2xf32, #tpu.memory_space<vmem>>, vector<8x2xf32>
      %33 = tpu.iota {dimensions = array<i32: 1>} : vector<8x2xi32>
      %c0_13 = arith.constant 0 : index
      %c0_14 = arith.constant 0 : index
      %34 = vector.load %arg5[%c0_13, %c0_14] : memref<8x1xi32, #tpu.memory_space<vmem>>, vector<8x1xi32>
      %35 = vector.broadcast %34 : vector<8x1xi32> to vector<8x2xi32>
      %36 = arith.cmpi slt, %33, %35 : vector<8x2xi32>
      %cst_15 = arith.constant 0x7FC00000 : f32
      %37 = vector.broadcast %cst_15 : f32 to vector<8x2xf32>
      %38 = arith.select %36, %37, %32 : vector<8x2xi1>, vector<8x2xf32>
      %c0_16 = arith.constant 0 : index
      %c0_17 = arith.constant 0 : index
      %39 = vector.load %arg3[%c0_16, %c0_17] : memref<8x2xf32, #tpu.memory_space<vmem>>, vector<8x2xf32>
      tpu.vector_store %arg3[%c0_16, %c0_17], %38 {strides = array<i32>} : memref<8x2xf32, #tpu.memory_space<vmem>>, vector<8x2xf32>,
    } else {
    }
    return
  }
  func.func @transform_0(%arg0: i32, %arg1: i32) -> (i32, i32) {
    %c0_i32 = arith.constant 0 : i32
    return %arg0, %arg1 : i32, i32
  }
  func.func @transform_1(%arg0: i32, %arg1: i32) -> (i32, i32) {
    %c0_i32 = arith.constant 0 : i32
    %c0_i32_0 = arith.constant 0 : i32
    return %arg0, %c0_i32 : i32, i32
  }
}

</mosaic_0001>

<bundles_post_ra>
// kernel: tpu_custom_call.1
= control target key start
LH: loop header
LB: loop body
LE: loop exit
PB: predicated region body
PF: predicated region fallthrough
CT: control target
= control target key end

     0   :  { %6 = vsyncpa [#allocation5], 0  ;;  %s160_s6 = smov [#allocation4]   ;;  %s191_s0 = inlined_call_operand.hbm [shape: f32[8,16], index: 0, kind: input, shape index: {}]   ;;  %s192_s1 = inlined_call_operand.vmem [shape: f32[8,2], index: 1, kind: output, shape index: {}]  }
   0x1   :  { %s13_s7 = sshll.u32 %s160_s6, 4  ;;  %s136_s10 = scalar_lea.hbm %s191_s0, 128  ;;  %s14_s7 = int_to_ptr.vmem [resolvable:$true] %s13_s7 }
   0x2   :  { %p137_p0 = scmp.ne.s32.totalorder %s191_s0, %s136_s10  ;;  %p140_p1 = scmp.lt.u32.totalorder %s136_s10, %s191_s0 }
   0x4   :  { %p142_p2 = pnand %p140_p1, %p137_p0 }
   0x6   :  { %145 = shalt.err (!%p142_p2)
}
   0x7   :  { %s146_s15 = scalar_lea.vmem %s14_s7, 128  ;;  %p151_p4 = scmp.lt.s32.totalorder %s14_s7, %s14_s7 }
   0x8   :  { %p147_p3 = scmp.ne.s32.totalorder %s14_s7, %s146_s15  ;;  %p152_p5 = scmp.lt.s32.totalorder %s146_s15, %s146_s15 }
   0xa   :  { %p153_p6 = por %p152_p5, %p151_p4 }
   0xc   :  { %p154_p7 = pnand %p153_p6, %p147_p3 }
   0xe   :  { %157 = shalt.err (!%p154_p7)
}
   0xf   :  { %16 = dma.hbm_to_vmem [thread:$0]  %s191_s0, 128, %s14_s7, [#allocation5]  }
  0x10   :  { %158 = dma.done.wait [#allocation5], 128  }
  0x11   :  { %159 = vsyncadd [#allocation5], 4294967168  ;;  %v20_v0 = vld [vmem:[#allocation4] sm:$0xff]  ;;  %vm23_vm0 = vcmask 130048   ;;  %v38_v3 = vlaneseq  ;;  %v161_v10 = vmov 0   ;;  %vm65_vm5 = vcmask 7168  }
  0x12   :  { %vm21_vm1 = vcmp.ne.f32.partialorder %v20_v0, %v20_v0  ;;  %135 = vset.pattern.permute.xlu0 %v161_v10  ;;  %vm71_vm6 = vcmask 15360  }
  0x13   :  { %v37_v1 = vsel %vm21_vm1, inf, %v20_v0  ;;  %v39_v4 = vand.u32 127, %v38_v3  ;;  %v22_v11 = vsel %vm21_vm1, 1, %v161_v10 }
  0x14   :  { %v40_v2 = vsel %vm23_vm0, %v37_v1, -inf  ;;  %v24_v12 = vsel %vm23_vm0, %v22_v11, 0 }
  0x15   :  { %41 = vmax.xlane.f32.xlu0 %v40_v2  ;;  %v25_v13 = vand.u32 65535, %v24_v12  ;;  %v26_v16 = vshrl.u32 %v24_v12, 16 }
  0x17   :  { %v27_v14 = vcvt.s32.f32 %v25_v13  ;;  %v28_v20 = vcvt.s32.f32 %v26_v16 }
  0xa2   :  { %v42_v5 = vpop.xlane.xlu0 %41 }
  0xa3   :  { %vm43_vm2 = vcmp.eq.f32.partialorder %v37_v1, %v42_v5 }
  0xa4   :  { %v44_v6 = vsel %vm43_vm2, %v39_v4, 16 }
  0xa5   :  { %v45_v7 = vsel %vm23_vm0, %v44_v6, 2147483647 }
  0xa6   :  { %v47_v8 = vshra.s32 %v45_v7, 16  ;;  %v46_v15 = vand.u32 65535, %v45_v7 }
  0xa8   :  { %v49_v9 = vcvt.s32.f32 %v47_v8  ;;  %v48_v18 = vcvt.s32.f32 %v46_v15 }
  0xaa   :  { %50 = vmin.xlane.f32.xlu0 %v49_v9 }
  0xae   :  { %29 = vadd.xlane.f32.xlu0 %v27_v14 }
 0x137   :  { %v51_v17 = vpop.xlane.xlu0 %50 }
 0x138   :  { %vm52_vm3 = vcmp.eq.f32.partialorder %v49_v9, %v51_v17  ;;  %v57_v21 = vcvt.f32.s32 %v51_v17 }
 0x139   :  { %v53_v19 = vsel %vm52_vm3, %v48_v18, inf }
 0x13a   :  { %54 = vmin.xlane.f32.xlu1 %v53_v19  ;;  %v58_v23 = vshll.u32 %v57_v21, 16 }
 0x13b   :  { %v30_v25 = vpop.xlane.xlu0 %29 }
 0x13c   :  { %v33_v29 = vcvt.f32.s32 %v30_v25 }
 0x13e   :  { %31 = vadd.xlane.f32.xlu1 %v28_v20 }
 0x1c7   :  { %v55_v22 = vpop.xlane.xlu1 %54 }
 0x1c8   :  { %v56_v24 = vcvt.f32.s32 %v55_v22 }
 0x1ca   :  { %v59_v26 = vadd.s32 %v58_v23, %v56_v24 }
 0x1cb   :  { %v32_v27 = vpop.xlane.xlu1 %31 }
 0x1cc   :  { %vm60_vm4 = vcmp.eq.s32.totalorder %v39_v4, %v59_v26  ;;  %v34_v28 = vcvt.f32.s32 %v32_v27 }
 0x1cd   :  { %v61_v30 = vsel %vm60_vm4, -inf, %v37_v1 }
 0x1ce   :  { %v62_v31 = vsel %vm23_vm0, %v61_v30, -inf  ;;  %v35_v32 = vshll.u32 %v34_v28, 16 }
 0x1cf   :  { %63 = vmax.xlane.f32.xlu1 %v62_v31 }
 0x1d0   :  { %v36_v33 = vadd.s32 %v35_v32, %v33_v29 }
 0x1d2   :  { %73 = vst.msk [vmem:[#allocation3] sm:$0xff] %vm65_vm5, %v36_v33 }
 0x1d9   :  { %v120_v34 = vld [vmem:[#allocation3] sm:$0xff] }
 0x1da   :  { %122 = vperm.xlu0 %135, %v120_v34  }
 0x259   :  { %v123_v37 = vpop.permute.xlu0 %122 }
 0x25a   :  { %vm124_vm7 = vcmp.lt.s32.totalorder %v39_v4, %v123_v37 }
 0x25c   :  { %v64_v35 = vpop.xlane.xlu1 %63 }
 0x25d   :  { %v66_v36 = vsel %vm65_vm5, %v42_v5, %v64_v35 }
 0x25e   :  { %72 = vst.msk [vmem:[#allocation2] sm:$0xff] %vm71_vm6, %v66_v36 }
 0x265   :  { %v119_v38 = vld [vmem:[#allocation2] sm:$0xff] }
 0x266   :  { %v125_v39 = vsel %vm124_vm7, nan, %v119_v38 }
 0x267   :  { %127 = vst.msk [vmem:[%s192_s1] sm:$0xff] %vm71_vm6, %v125_v39 }
 0x268   :  { %132 = vsyncpa [#allocation5], 1 }

</bundles_post_ra>
